<compile_context>
chip_gen: v5e
topology: v5e:2x2
jax: 0.10.0
libtpu: 0.0.40
codegen_flags: <defaults>
</compile_context>

<pallas_src>
import jax
import jax.numpy as jnp
from jax.experimental import pallas as pl
from jax.experimental.pallas import tpu as pltpu


def _identity_kernel(x_ref, o_ref):
    # Elementwise hot path: straight VMEM copy of the current tile.
    o_ref[...] = x_ref[...]


_LANE_CANDIDATES = (4096, 2048, 1024, 512, 256, 128)


def _vmem_capacity_bytes():
    """Trace-time VMEM capacity query with a conservative fallback."""
    try:
        info = pltpu.get_tpu_info()
        cap = int(getattr(info, "vmem_capacity_bytes", 0) or 0)
        if cap > 0:
            return cap
    except Exception:
        pass
    return 64 * 1024 * 1024  # conservative: v7x physical VMEM per TC


def _sublane_multiple(itemsize):
    # Packed dtypes need the second-to-last block dim rounded to their
    # sublane packing: 8 (32-bit), 16 (16-bit), 32 (8-bit).
    if itemsize >= 4:
        return 8
    if itemsize == 2:
        return 16
    return 32


def batchnorm2d_forward(x):
    """Identity forward matching the reference module. x: (N, C, H, W)."""
    orig_shape = x.shape
    total = x.size
    itemsize = jnp.dtype(x.dtype).itemsize

    # Lane-dense flat view: (rows, lane) with lane a large multiple of 128 so
    # every generation emits unmasked full-width vst.
    lane = None
    for cand in _LANE_CANDIDATES:
        if total and total % cand == 0:
            lane = cand
            break
    if lane is None:
        # Ragged / tiny sizes: the pass-through answer is just x.  Avoids the
        # old jnp.pad + slice round trips that doubled HBM traffic and broke
        # the CostEstimate.
        return x

    rows = total // lane
    x2d = x.reshape(rows, lane)

    # Generation-aware block sizing: target ~4-8 MiB per block buffer; the
    # BlockSpec pipeline holds 4 buffers (in + out, each double-buffered), so
    # keep 4*block comfortably inside the scoped-VMEM budget on every chip.
    vmem_cap = _vmem_capacity_bytes()
    budget = min(vmem_cap // 2, 28 * 1024 * 1024)          # total for 4 buffers
    block_bytes = max(1 * 1024 * 1024, min(8 * 1024 * 1024, budget // 4))

    sub = _sublane_multiple(itemsize)
    tr = max(1, block_bytes // (lane * itemsize))
    if tr >= rows:
        tr = rows  # full-extent block is always a legal block size
    else:
        tr = max(sub, (tr // sub) * sub)

    grid = (pl.cdiv(rows, tr),)
    block_bytes_actual = tr * lane * itemsize
    # Explicit VMEM limit so >4 MiB blocks don't hit v5e's 16 MiB scoped
    # default; never exceeds the physical capacity reported for this chip.
    vmem_limit = int(
        min(vmem_cap,
            max(32 * 1024 * 1024, 4 * block_bytes_actual + 4 * 1024 * 1024)))

    out2d = pl.pallas_call(
        _identity_kernel,
        out_shape=jax.ShapeDtypeStruct((rows, lane), x.dtype),
        grid_spec=pltpu.PrefetchScalarGridSpec(
            num_scalar_prefetch=0,
            grid=grid,
            in_specs=[pl.BlockSpec((tr, lane), lambda i: (i, 0))],
            out_specs=pl.BlockSpec((tr, lane), lambda i: (i, 0)),
        ),
        compiler_params=pltpu.CompilerParams(
            # Independent tiles; only pays off on v7x (2 TCs), harmless on
            # single-TC v5e/v6e.
            dimension_semantics=("parallel",),
            vmem_limit_bytes=vmem_limit,
        ),
        cost_estimate=pl.CostEstimate(
            flops=0,
            transcendentals=0,
            bytes_accessed=2 * total * itemsize,
        ),
        # Donate the input slab to the output: drops the extra HBM output
        # allocation.  Safe because every tile is fully read before the
        # same-index output tile is written.
        input_output_aliases={0: 0},
    )(x2d)

    return out2d.reshape(orig_shape)


if __name__ == "__main__":
    key = jax.random.PRNGKey(0)
    x = jax.random.normal(key, (2, 4, 16, 16), dtype=jnp.float32)

    fwd = jax.jit(batchnorm2d_forward)
    y = fwd(x)
    y = jax.block_until_ready(y)

    assert y.shape == x.shape, (y.shape, x.shape)
    assert y.dtype == x.dtype, (y.dtype, x.dtype)
    assert bool(jnp.allclose(y, x)), "identity forward mismatch"

    print("KERNEL_OK")
</pallas_src>

<mosaic_0001>
module attributes {stable_mosaic.version = 11 : i64} {
  func.func @_identity_kernel(%arg0: i32, %arg1: memref<1x2048xf32, #tpu.memory_space<vmem>>, %arg2: memref<1x2048xf32, #tpu.memory_space<vmem>>) attributes {dimension_semantics = [#tpu.dimension_semantics<parallel>], iteration_bounds = array<i64: 1>, scalar_prefetch = 0 : i64, scratch_operands = 0 : i64, tpu.core_type = #tpu.core_type<tc>, window_params = [{transform_indices = @transform_0, window_bounds = array<i64: 1, 2048>}, {transform_indices = @transform_1, window_bounds = array<i64: 1, 2048>}]} {
    %c0 = arith.constant 0 : index
    %c0_0 = arith.constant 0 : index
    %0 = vector.load %arg1[%c0, %c0_0] : memref<1x2048xf32, #tpu.memory_space<vmem>>, vector<1x2048xf32>
    %c0_1 = arith.constant 0 : index
    %c0_2 = arith.constant 0 : index
    %1 = vector.load %arg2[%c0_1, %c0_2] : memref<1x2048xf32, #tpu.memory_space<vmem>>, vector<1x2048xf32>
    tpu.vector_store %arg2[%c0_1, %c0_2], %0 {strides = array<i32>} : memref<1x2048xf32, #tpu.memory_space<vmem>>, vector<1x2048xf32>,
    return
  }
  func.func @transform_0(%arg0: i32) -> (i32, i32) {
    %c0_i32 = arith.constant 0 : i32
    %c0_i32_0 = arith.constant 0 : i32
    return %arg0, %c0_i32 : i32, i32
  }
  func.func @transform_1(%arg0: i32) -> (i32, i32) {
    %c0_i32 = arith.constant 0 : i32
    %c0_i32_0 = arith.constant 0 : i32
    return %arg0, %c0_i32 : i32, i32
  }
}

</mosaic_0001>

<bundles_post_ra>
// kernel: batchnorm2d_forward.1
= control target key start
LH: loop header
LB: loop body
LE: loop exit
PB: predicated region body
PF: predicated region fallthrough
CT: control target
= control target key end

     0   :  { %s38_s0 = inlined_call_operand.vmem [shape: f32[1,2048], index: 0, kind: input, shape index: {}, may-alias: {0,1}]   ;;  %s39_s1 = inlined_call_operand.vmem [shape: f32[1,2048], index: 1, kind: output, shape index: {}, may-alias: {0,1}]  }
   0x1   :  { %v8_v0 = vld [vmem:[%s38_s0] sm:$0xff]  ;;  %v9_v1 = vld [vmem:[%s38_s0 + $0x8] sm:$0xff] }
   0x2   :  { %10 = vst [vmem:[%s39_s1] sm:$0xff] %v8_v0 }
   0x3   :  { %11 = vst [vmem:[%s39_s1 + $0x8] sm:$0xff] %v9_v1 }

</bundles_post_ra>
